<compile_context>
chip_gen: v5e
topology: v5e:2x2
jax: 0.10.0
libtpu: 0.0.40
codegen_flags: <defaults>
</compile_context>

<pallas_src>
import jax
import jax.numpy as jnp
from jax.experimental import pallas as pl
from jax.experimental.pallas import tpu as pltpu


def _variance_fill_kernel(var_ref, o_ref):
    # var_ref: SMEM scalar-prefetch ref of shape (1,) holding `variance` (f32).
    # o_ref:   VMEM output tile of shape (tile_rows, 128), lane-dense.
    v = var_ref[0]
    s = jnp.exp(v * 10.0)  # scalar exp -> EUP slot, free
    o_ref[...] = jnp.full(o_ref.shape, s, dtype=o_ref.dtype)


def single_variance_forward(x: jax.Array, variance: jax.Array, *, tile_rows: int = 512) -> jax.Array:
    """Equivalent of SingleVarianceNetwork.forward.

    x:        (N, ...) array; only len(x) and dtype matter.
    variance: scalar parameter (float32).
    returns:  (N, 1) array of dtype x.dtype, filled with exp(10 * variance).
    """
    n = int(x.shape[0])
    dtype = x.dtype
    lanes = 128

    # Lane-dense layout: N scalar outputs packed as (rows, 128).
    rows = max(pl.cdiv(n, lanes), 1)
    # Pad rows to a multiple of 8 (sublane) then to a multiple of the tile.
    rows_p = ((rows + 7) // 8) * 8
    t = min(tile_rows, rows_p)
    rows_p = ((rows_p + t - 1) // t) * t
    grid = (rows_p // t,)

    var_arr = jnp.reshape(jnp.asarray(variance, dtype=jnp.float32), (1,))

    out_padded = pl.pallas_call(
        _variance_fill_kernel,
        out_shape=jax.ShapeDtypeStruct((rows_p, lanes), dtype),
        grid_spec=pltpu.PrefetchScalarGridSpec(
            num_scalar_prefetch=1,
            grid=grid,
            in_specs=[],
            out_specs=pl.BlockSpec((t, lanes), lambda i, var: (i, 0)),
        ),
        compiler_params=pltpu.CompilerParams(
            dimension_semantics=("parallel",),
        ),
    )(var_arr)

    # Contiguous reshape + static slice back to the PyTorch output layout.
    return out_padded.reshape(rows_p * lanes)[:n].reshape(n, 1)


if __name__ == "__main__":
    key = jax.random.PRNGKey(0)

    # Small example input: 8 points with 3 features (forward only uses
    # len(x) and dtype, mirroring the PyTorch module).
    x = jax.random.normal(key, (8, 3), dtype=jnp.float32)
    init_val = 0.3
    variance = jnp.asarray(init_val, dtype=jnp.float32)

    out = single_variance_forward(x, variance)
    out = jax.block_until_ready(out)

    ref = jnp.ones((x.shape[0], 1), dtype=x.dtype) * jnp.exp(variance * 10.0)
    assert out.shape == (x.shape[0], 1)
    assert out.dtype == x.dtype
    assert jnp.allclose(out, ref, rtol=1e-6, atol=1e-6)

    # Second check: N not a multiple of 128 and a multi-step grid
    # (tile_rows=8 -> 2 grid steps at N=2048), exercising padding + slicing.
    x2 = jax.random.normal(key, (2048, 3), dtype=jnp.float32)
    out2 = jax.block_until_ready(single_variance_forward(x2, variance, tile_rows=8))
    ref2 = jnp.ones((x2.shape[0], 1), dtype=x2.dtype) * jnp.exp(variance * 10.0)
    assert out2.shape == (x2.shape[0], 1)
    assert out2.dtype == x2.dtype
    assert jnp.allclose(out2, ref2, rtol=1e-6, atol=1e-6)

    print("KERNEL_OK")
</pallas_src>

<mosaic_0001>
module attributes {stable_mosaic.version = 11 : i64} {
  func.func @_variance_fill_kernel(%arg0: i32, %arg1: memref<1xf32, #tpu.memory_space<smem>>, %arg2: memref<8x128xf32, #tpu.memory_space<vmem>>) attributes {dimension_semantics = [#tpu.dimension_semantics<parallel>], iteration_bounds = array<i64: 1>, scalar_prefetch = 1 : i64, scratch_operands = 0 : i64, tpu.core_type = #tpu.core_type<tc>, window_params = [{transform_indices = @transform_0, window_bounds = array<i64: 8, 128>}]} {
    %c0 = arith.constant 0 : index
    %0 = memref.load %arg1[%c0] : memref<1xf32, #tpu.memory_space<smem>>
    %cst = arith.constant 1.000000e+01 : f32
    %1 = arith.mulf %0, %cst : f32
    %2 = math.exp %1 : f32
    %3 = vector.broadcast %2 : f32 to vector<8x128xf32>
    %c0_0 = arith.constant 0 : index
    %c0_1 = arith.constant 0 : index
    %4 = vector.load %arg2[%c0_0, %c0_1] : memref<8x128xf32, #tpu.memory_space<vmem>>, vector<8x128xf32>
    tpu.vector_store %arg2[%c0_0, %c0_1], %3 {strides = array<i32>} : memref<8x128xf32, #tpu.memory_space<vmem>>, vector<8x128xf32>,
    return
  }
  func.func @transform_0(%arg0: i32, %arg1: memref<1xf32, #tpu.memory_space<smem>>) -> (i32, i32) {
    %c0_i32 = arith.constant 0 : i32
    %c0_i32_0 = arith.constant 0 : i32
    return %arg0, %c0_i32 : i32, i32
  }
}

</mosaic_0001>

<bundles_post_ra>
// kernel: tpu_custom_call.1
= control target key start
LH: loop header
LB: loop body
LE: loop exit
PB: predicated region body
PF: predicated region fallthrough
CT: control target
= control target key end

     0   :  { %s80_s0 = inlined_call_operand.<no memory space> [shape: f32[1], index: 0, kind: input, shape index: {}]   ;;  %s81_s1 = inlined_call_operand.hbm [shape: f32[8,128], index: 1, kind: output, shape index: {}]  }
   0x1   :  { %s9_s8 = smul.f32 10.0, %s80_s0 }
   0x2   :  { %7 = vsyncpa [#allocation5], 0  ;;  %s63_s9 = smov [#allocation4]   ;;  %s23_s13 = sshll.u32 %s81_s1, 4  ;;  %s24_s13 = int_to_ptr.hbm [resolvable:$true] %s23_s13 }
   0x3   :  { %v10_v0 = vstv %s9_s8  ;;  %s21_s10 = sshll.u32 %s63_s9, 4  ;;  %s22_s10 = int_to_ptr.vmem [resolvable:$true] %s21_s10 }
   0x4   :  { %v11_v1 = vmul.f32 1.442695, %v10_v0 }
   0x6   :  { %35 = vpow2.f32 %v11_v1 }
   0xc   :  { %v36_v2 = vpop.eup %35 }
   0xd   :  { %32 = vpush %v36_v2 }
  0x3e   :  { %s33_s14 = spop %32 }
  0x3f   :  { %v14_v3 = vstv %s33_s14 }
  0x40   :  { %15 = vst [vmem:[#allocation4] sm:$0xff] %v14_v3 }
  0x41   :  { %26 = dma.vmem_to_hbm [thread:$0]  %s22_s10, 128, %s24_s13, [#allocation5]  }
  0x42   :  { %61 = dma.done.wait [#allocation5], 128  }
  0x43   :  { %62 = vsyncadd [#allocation5], 4294967168 }
  0x44   :  { %31 = vsyncpa [#allocation5], 1 }

</bundles_post_ra>
